<compile_context>
chip_gen: v5e
topology: v5e:2x2
jax: 0.10.0
libtpu: 0.0.40
codegen_flags: <defaults>
</compile_context>

<pallas_src>
import functools

import jax
import jax.numpy as jnp
from jax.experimental import pallas as pl
from jax.experimental.pallas import tpu as pltpu


# Target bytes for the streamed x tiles (2 pipeline buffers + the in-kernel x*mask
# temporary).  Conservative enough that total scoped VMEM stays ~32 MiB, which fits
# v5e/v6e (128 MiB physical) and v7x (64 MiB physical) with plenty of headroom.
_X_BUDGET = 10 * 1024 * 1024


def _round_up(n, m):
    return ((n + m - 1) // m) * m


# ---------------------------------------------------------------------------
# Kernels
# ---------------------------------------------------------------------------

def _cls_linear_kernel(x_ref, w_ref, b_ref, o_ref):
    # x_ref: (TB, Din) f32 BOS tokens, w_ref: (Din, Dout_p) f32, b_ref: (1, Dout_p) f32
    out = jnp.dot(x_ref[...], w_ref[...], preferred_element_type=jnp.float32) + b_ref[...]
    o_ref[...] = out.astype(o_ref.dtype)


def _mean_linear_kernel(x_ref, m_ref, w_ref, b_ref, o_ref, acc_ref, cnt_ref,
                        *, seq_len, s_tile):
    # x_ref: (TB, s_tile, Din) f32, m_ref: (TB, s_tile) f32
    # acc_ref: (TB, Din) f32 pooled sum, cnt_ref: (TB, 1) f32 mask count
    s = pl.program_id(1)

    @pl.when(s == 0)
    def _init():
        acc_ref[...] = jnp.zeros_like(acc_ref)
        cnt_ref[...] = jnp.zeros_like(cnt_ref)

    x = x_ref[...]
    m = m_ref[...]
    if seq_len % s_tile != 0:
        # Ragged tail along S: the out-of-range part of the block holds undefined
        # data (could be NaN), so select it away with `where` rather than *0.
        col = s * s_tile + jax.lax.broadcasted_iota(jnp.int32, m.shape, 1)
        valid = col < seq_len
        m = jnp.where(valid, m, 0.0)
        x = jnp.where(valid[:, :, None], x, 0.0)

    acc_ref[...] += jnp.sum(x * m[:, :, None], axis=1)     # (TB, Din)
    cnt_ref[...] += jnp.sum(m, axis=1, keepdims=True)      # (TB, 1)

    @pl.when(s == pl.num_programs(1) - 1)
    def _finalize():
        # EUP reciprocal + (TB,1)-broadcast multiply instead of a full-width divide.
        # Rows with an all-zero mask produce NaN, matching the PyTorch 0/0 behavior.
        sent = acc_ref[...] * pl.reciprocal(cnt_ref[...], approx=False)
        out = jnp.dot(sent, w_ref[...], preferred_element_type=jnp.float32) + b_ref[...]
        o_ref[...] = out.astype(o_ref.dtype)


# ---------------------------------------------------------------------------
# Tiling / VMEM sizing
# ---------------------------------------------------------------------------

def _cap_for_two_cores(row_tile, B):
    # v7x has 2 TensorCores; make sure the 'parallel' batch axis has >=2 tiles
    # whenever the batch is big enough for that to be meaningful.
    if B > 8:
        row_tile = min(row_tile, _round_up(pl.cdiv(B, 2), 8))
    return row_tile


def _cls_tiles(B, Din):
    row_tile = (_X_BUDGET // (2 * Din * 4)) // 8 * 8
    row_tile = int(max(8, min(row_tile, _round_up(B, 8), 1024)))
    return _cap_for_two_cores(row_tile, B)


def _mean_tiles(B, S, Din):
    """Pick (row_tile, s_tile) so 3 copies of the x tile (double buffer + x*mask temp)
    stay within _X_BUDGET.  s_tile is either the full S, or a multiple of 128 so the
    2-D mask block stays lane-aligned."""
    if 3 * 8 * S * Din * 4 <= _X_BUDGET or S < 256:
        s_tile = S
    else:
        s_tile = (_X_BUDGET // (3 * 8 * Din * 4)) // 128 * 128
        s_tile = max(128, min(s_tile, (S // 128) * 128))
        if s_tile >= S:
            s_tile = S
    row_tile = (_X_BUDGET // (3 * s_tile * Din * 4)) // 8 * 8
    row_tile = int(max(8, min(row_tile, _round_up(B, 8), 1024)))
    return _cap_for_two_cores(row_tile, B), int(s_tile)


def _cls_vmem_bytes(row_tile, Din, Dout_p):
    return (2 * row_tile * Din * 4          # x blocks (double-buffered)
            + 2 * Din * Dout_p * 4          # w (resident, 2 buffers)
            + 2 * 8 * Dout_p * 4            # bias
            + 2 * row_tile * Dout_p * 4)    # output blocks


def _mean_vmem_bytes(row_tile, s_tile, Din, Dout_p):
    return (3 * row_tile * s_tile * Din * 4             # x blocks + x*mask temp
            + 2 * row_tile * max(s_tile, 128) * 4       # mask blocks
            + 2 * Din * Dout_p * 4                      # w
            + 2 * 8 * Dout_p * 4                        # bias
            + 2 * row_tile * Dout_p * 4                 # output blocks
            + row_tile * Din * 4 + row_tile * 128 * 4)  # acc + cnt scratch


def _vmem_limit(nbytes):
    # Analytic estimate + 25% + 2 MiB headroom, floored at the 32 MiB scoped default.
    # With the tile budget above this stays well under v7x's 64 MiB physical VMEM.
    return int(max(32 << 20, int(nbytes * 1.25) + (2 << 20)))


# ---------------------------------------------------------------------------
# Wrapper
# ---------------------------------------------------------------------------

def bos_token_linear(x, attn_mask, params, pooler="cls", row_tile=None, s_tile=None):
    """x: (B, S, Din), attn_mask: (B, S), params: {'w': (Din, Dout), 'b': (Dout,)}."""
    B, S, Din = x.shape
    w = params["w"].astype(jnp.float32)                  # (Din, Dout)
    b = params["b"].astype(jnp.float32)                  # (Dout,)
    Dout = w.shape[1]

    # Keep the output store lane-dense (unmasked vst) and MXU output lanes dense.
    Dout_p = _round_up(Dout, 128)
    if Dout_p != Dout:
        w = jnp.pad(w, ((0, 0), (0, Dout_p - Dout)))
        b = jnp.pad(b, (0, Dout_p - Dout))
    b2 = b.reshape(1, Dout_p)

    if pooler == "cls":
        # BOS token selected outside the kernel (only B*Din elements reach the call;
        # attn_mask is never DMA'd).
        # TODO(synk): fuse this gather into a (row_tile, 1, Din) BlockSpec once
        # second-minor block dims of 1 are allowed, saving one tiny HBM roundtrip.
        xb = x[:, 0, :]
        rt = row_tile if row_tile is not None else _cls_tiles(B, Din)
        grid = (pl.cdiv(B, rt),)
        cparams = pltpu.CompilerParams(
            dimension_semantics=("parallel",),
            vmem_limit_bytes=_vmem_limit(_cls_vmem_bytes(rt, Din, Dout_p)),
        )
        out = pl.pallas_call(
            _cls_linear_kernel,
            out_shape=jax.ShapeDtypeStruct((B, Dout_p), jnp.float32),
            grid=grid,
            in_specs=[
                pl.BlockSpec((rt, Din), lambda i: (i, 0)),
                pl.BlockSpec((Din, Dout_p), lambda i: (0, 0)),   # resident
                pl.BlockSpec((1, Dout_p), lambda i: (0, 0)),     # resident
            ],
            out_specs=pl.BlockSpec((rt, Dout_p), lambda i: (i, 0)),
            compiler_params=cparams,
        )(xb, w, b2)

    elif pooler == "mean":
        mp = attn_mask.astype(jnp.float32)
        rt, st = _mean_tiles(B, S, Din)
        if row_tile is not None:
            rt = row_tile
        if s_tile is not None:
            st = s_tile
        grid = (pl.cdiv(B, rt), pl.cdiv(S, st))          # reduction axis (S) last
        cparams = pltpu.CompilerParams(
            dimension_semantics=("parallel", "arbitrary"),
            vmem_limit_bytes=_vmem_limit(_mean_vmem_bytes(rt, st, Din, Dout_p)),
        )
        kernel = functools.partial(_mean_linear_kernel, seq_len=S, s_tile=st)
        # TODO(synk): single-buffer w/b via pipeline_mode=pl.Buffered(1) to halve their
        # resident VMEM once that mode is guaranteed for constant index_maps.
        out = pl.pallas_call(
            kernel,
            out_shape=jax.ShapeDtypeStruct((B, Dout_p), jnp.float32),
            grid=grid,
            in_specs=[
                pl.BlockSpec((rt, st, Din), lambda i, s: (i, s, 0)),
                pl.BlockSpec((rt, st), lambda i, s: (i, s)),
                pl.BlockSpec((Din, Dout_p), lambda i, s: (0, 0)),   # resident
                pl.BlockSpec((1, Dout_p), lambda i, s: (0, 0)),     # resident
            ],
            out_specs=pl.BlockSpec((rt, Dout_p), lambda i, s: (i, 0)),
            scratch_shapes=[
                pltpu.VMEM((rt, Din), jnp.float32),   # pooled sum accumulator
                pltpu.VMEM((rt, 1), jnp.float32),     # mask count accumulator
            ],
            compiler_params=cparams,
        )(x, mp, w, b2)
    else:
        raise ValueError(f"unknown pooler: {pooler}")

    return out[:, :Dout]


# ---------------------------------------------------------------------------
# Params / reference / test
# ---------------------------------------------------------------------------

def init_params(key, in_dim, out_dim):
    """xavier-normal weight (stored pre-transposed [in, out]) + uniform bias,
    mirroring nn.Linear with xavier_normal_ applied to the weight only."""
    kw, kb = jax.random.split(key)
    std = (2.0 / (in_dim + out_dim)) ** 0.5
    w = std * jax.random.normal(kw, (in_dim, out_dim), dtype=jnp.float32)
    bound = 1.0 / (in_dim ** 0.5)
    b = jax.random.uniform(kb, (out_dim,), jnp.float32, -bound, bound)
    return {"w": w, "b": b}


def _reference_np(x, attn_mask, params, pooler):
    import numpy as np
    x64 = np.asarray(x, np.float64)
    m64 = np.asarray(attn_mask, np.float64)
    w64 = np.asarray(params["w"], np.float64)
    b64 = np.asarray(params["b"], np.float64)
    if pooler == "cls":
        sent = x64[:, 0, :]
    else:
        sent = (x64 * m64[:, :, None]).sum(1) / m64.sum(1, keepdims=True)
    return sent @ w64 + b64


if __name__ == "__main__":
    import numpy as np

    B, S, Din, Dout = 2, 8, 32, 16
    key = jax.random.PRNGKey(0)
    kx, km, kp = jax.random.split(key, 3)

    x = jax.random.normal(kx, (B, S, Din), dtype=jnp.float32)
    attn_mask = (jax.random.uniform(km, (B, S)) > 0.3).astype(jnp.float32)
    attn_mask = attn_mask.at[:, 0].set(1.0)   # keep at least the BOS token valid
    params = init_params(kp, Din, Dout)

    ok = True
    for pooler in ("cls", "mean"):
        out = jax.block_until_ready(bos_token_linear(x, attn_mask, params, pooler=pooler))
        ref = _reference_np(x, attn_mask, params, pooler)
        assert out.shape == (B, Dout)
        # Tolerance covers whatever f32 matmul pass configuration the MXU uses.
        ok &= bool(np.allclose(np.asarray(out, np.float64), ref, atol=2e-2, rtol=2e-2))

    assert ok
    print("KERNEL_OK")
</pallas_src>

<mosaic_0001>
module attributes {stable_mosaic.version = 11 : i64} {
  func.func @_cls_linear_kernel(%arg0: i32, %arg1: memref<8x32xf32, #tpu.memory_space<vmem>>, %arg2: memref<32x128xf32, #tpu.memory_space<vmem>>, %arg3: memref<1x128xf32, #tpu.memory_space<vmem>>, %arg4: memref<8x128xf32, #tpu.memory_space<vmem>>) attributes {dimension_semantics = [#tpu.dimension_semantics<parallel>], iteration_bounds = array<i64: 1>, scalar_prefetch = 0 : i64, scratch_operands = 0 : i64, tpu.core_type = #tpu.core_type<tc>, window_params = [{transform_indices = @transform_0, window_bounds = array<i64: 8, 32>}, {pipeline_mode = #tpu.pipeline_mode<synchronous>, transform_indices = @transform_1, window_bounds = array<i64: 32, 128>}, {pipeline_mode = #tpu.pipeline_mode<synchronous>, transform_indices = @transform_2, window_bounds = array<i64: 1, 128>}, {transform_indices = @transform_3, window_bounds = array<i64: 8, 128>}]} {
    %c0 = arith.constant 0 : index
    %c0_0 = arith.constant 0 : index
    %0 = vector.load %arg1[%c0, %c0_0] : memref<8x32xf32, #tpu.memory_space<vmem>>, vector<8x32xf32>
    %c0_1 = arith.constant 0 : index
    %c0_2 = arith.constant 0 : index
    %1 = vector.load %arg2[%c0_1, %c0_2] : memref<32x128xf32, #tpu.memory_space<vmem>>, vector<32x128xf32>
    %cst = arith.constant dense<0.000000e+00> : vector<8x128xf32>
    %2 = tpu.matmul %0, %1, %cst {dimension_numbers = #tpu.dot_dimension_numbers<[1], [0], [0], [1], [0, 0, 1, 1], [], []>} : vector<8x32xf32>, vector<32x128xf32>, vector<8x128xf32> -> vector<8x128xf32>
    %c0_3 = arith.constant 0 : index
    %c0_4 = arith.constant 0 : index
    %3 = vector.load %arg3[%c0_3, %c0_4] : memref<1x128xf32, #tpu.memory_space<vmem>>, vector<1x128xf32>
    %4 = vector.broadcast %3 : vector<1x128xf32> to vector<8x128xf32>
    %5 = arith.addf %2, %4 : vector<8x128xf32>
    %c0_5 = arith.constant 0 : index
    %c0_6 = arith.constant 0 : index
    %6 = vector.load %arg4[%c0_5, %c0_6] : memref<8x128xf32, #tpu.memory_space<vmem>>, vector<8x128xf32>
    tpu.vector_store %arg4[%c0_5, %c0_6], %5 {strides = array<i32>} : memref<8x128xf32, #tpu.memory_space<vmem>>, vector<8x128xf32>,
    return
  }
  func.func @transform_0(%arg0: i32) -> (i32, i32) {
    %c0_i32 = arith.constant 0 : i32
    %c0_i32_0 = arith.constant 0 : i32
    return %arg0, %c0_i32 : i32, i32
  }
  func.func @transform_1(%arg0: i32) -> (i32, i32) {
    %c0_i32 = arith.constant 0 : i32
    %c0_i32_0 = arith.constant 0 : i32
    %c0_i32_1 = arith.constant 0 : i32
    return %c0_i32, %c0_i32_0 : i32, i32
  }
  func.func @transform_2(%arg0: i32) -> (i32, i32) {
    %c0_i32 = arith.constant 0 : i32
    %c0_i32_0 = arith.constant 0 : i32
    %c0_i32_1 = arith.constant 0 : i32
    return %c0_i32, %c0_i32_0 : i32, i32
  }
  func.func @transform_3(%arg0: i32) -> (i32, i32) {
    %c0_i32 = arith.constant 0 : i32
    %c0_i32_0 = arith.constant 0 : i32
    return %arg0, %c0_i32 : i32, i32
  }
}

</mosaic_0001>

<bundles_post_ra>
// kernel: tpu_custom_call.1
= control target key start
LH: loop header
LB: loop body
LE: loop exit
PB: predicated region body
PF: predicated region fallthrough
CT: control target
= control target key end

     0   :  { %8 = vsyncpa [#allocation3], 0  ;;  %s233_s0 = inlined_call_operand.hbm [shape: f32[2,32], index: 0, kind: input, shape index: {}]   ;;  %s234_s1 = inlined_call_operand.hbm [shape: f32[32,128], index: 1, kind: input, shape index: {}]   ;;  %s235_s2 = inlined_call_operand.vmem [shape: f32[1,128], index: 2, kind: input, shape index: {}]   ;;  %s236_s3 = inlined_call_operand.hbm [shape: f32[2,128], index: 3, kind: output, shape index: {}]  }
   0x1   :  { %9 = vsyncpa [#allocation6], 0 }
   0x2   :  { %10 = vsyncpa [#allocation4], 0 }
   0x3   :  { %14 = vsyncadd [#allocation3], 96  ;;  %s15_s14 = sshll.u32 %s233_s0, 4  ;;  %s188_s15 = smov [#allocation2]   ;;  %s16_s14 = int_to_ptr.hbm [resolvable:$true] %s15_s14 }
   0x4   :  { %s17_s16 = sshll.u32 %s188_s15, 4  ;;  %s28_s19 = sshll.u32 %s234_s1, 4  ;;  %s18_s16 = int_to_ptr.vmem [resolvable:$true] %s17_s16  ;;  %s29_s19 = int_to_ptr.hbm [resolvable:$true] %s28_s19 }
   0x5   :  { %s189_s20 = smov 32   ;;  %s190_s21 = smov 2  }
   0x6   :  { %23 = dma.hbm_to_vmem [thread:$0]  %s16_s14, 32, %s18_s16, [#allocation3], %s189_s20, %s189_s20, %s190_s21  }
   0x7   :  { %s191_s22 = smov [#allocation5]   ;;  %s192_s24 = smov 128  }
   0x8   :  { %s30_s23 = sshll.u32 %s191_s22, 4  ;;  %s193_s0 = smov 8   ;;  %s31_s23 = int_to_ptr.vmem [resolvable:$true] %s30_s23 }
   0x9   :  { %36 = dma.hbm_to_vmem [thread:$0]  %s29_s19, 512, %s31_s23, [#allocation6], %s192_s24, %s192_s24, %s193_s0  }
   0xa   :  { %182 = dma.done.wait [#allocation3], 128  }
   0xb   :  { %183 = vsyncadd [#allocation3], 4294967168 }
   0xc   :  { %184 = dma.done.wait [#allocation6], 512  }
   0xd   :  { %185 = vsyncadd [#allocation6], 4294966784  ;;  %v51_v0 = vld [vmem:[#allocation5 + $0x18] sm:$0xff]  ;;  %v50_v1 = vld [vmem:[#allocation5 + $0x10] sm:$0xff]  ;;  %vm56_vm0 = vcmask 261120  }
   0xe   :  { %72 = vmatpush.msra.mxu0 %v51_v0  ;;  %v49_v2 = vld [vmem:[#allocation5 + $0x8] sm:$0xff]  ;;  %v48_v3 = vld [vmem:[#allocation5] sm:$0xff]  ;;  %v47_v4 = vld [vmem:[#allocation2] sm:$0xff] }
   0xf   :  { %v109_v5 = vld [vmem:[%s235_s2] ss:$0 sm:$0xff] }
  0x10   :  { %73 = vmatpush.msra.mxu0 %v50_v1 }
  0x12   :  { %74 = vmatpush.msra.mxu0 %v49_v2 }
  0x14   :  { %75 = vmatpush.msra.mxu0 %v48_v3 }
  0x15   :  { %101 = vmatmul.msk.f32.vlgmr.msra.gmra.mxu0 %vm56_vm0, %v47_v4 }
  0x92   :  { %v77_v6 = vpop.f32.mrf.mxu0 }
  0x93   :  { %v78_v7 = vadd.f32 %v109_v5, %v77_v6 }
  0x95   :  { %80 = vst [vmem:[#allocation7] sm:$0xff] %v78_v7 }
  0x96   :  { %84 = vsyncadd [#allocation4], 96  ;;  %s87_s28 = sshll.u32 %s236_s3, 4  ;;  %s194_s29 = smov [#allocation7]   ;;  %s88_s28 = int_to_ptr.hbm [resolvable:$true] %s87_s28 }
  0x97   :  { %s85_s30 = sshll.u32 %s194_s29, 4  ;;  %s86_s30 = int_to_ptr.vmem [resolvable:$true] %s85_s30 }
  0x98   :  { %93 = dma.vmem_to_hbm [thread:$0]  %s86_s30, 32, %s88_s28, [#allocation4], %s189_s20, %s189_s20, %s190_s21  }
  0x99   :  { %186 = dma.done.wait [#allocation4], 128  }
  0x9a   :  { %187 = vsyncadd [#allocation4], 4294967168 }
  0x9b   :  { %98 = vsyncpa [#allocation3], 1 }
  0x9c   :  { %99 = vsyncpa [#allocation6], 1 }
  0x9d   :  { %100 = vsyncpa [#allocation4], 1 }

</bundles_post_ra>
